<compile_context>
chip_gen: v5e
topology: v5e:2x2
jax: 0.10.0
libtpu: 0.0.40
codegen_flags: <defaults>
</compile_context>

<pallas_src>
import functools

import jax
import jax.numpy as jnp
from jax.experimental import pallas as pl
from jax.experimental.pallas import tpu as pltpu

_N_CORES = 2  # partial-sum split width (v7x has 2 TCs; harmless elsewhere)


def _weighted_ce_kernel(logits_ref, targets_ref, cw_ref, out_ref,
                        acc_ref, w_ref, *, n_rows, tile_rows,
                        blocks_per_core, needs_mask):
    c = pl.program_id(0)          # core / partial-sum index ("parallel")
    i = pl.program_id(1)          # batch-tile index within this core ("arbitrary")
    n_inner = pl.num_programs(1)

    @pl.when(i == 0)
    def _init():
        acc_ref[...] = jnp.zeros_like(acc_ref)
        # softmax over the learnable class weights (torch: dim=0 of [C] vector)
        cw = cw_ref[...].astype(jnp.float32)                       # (1, C)
        cw = cw - jnp.max(cw, axis=-1, keepdims=True)
        e = jnp.exp(cw)
        w_ref[...] = e / jnp.sum(e, axis=-1, keepdims=True)        # exact, runs once

    logits = logits_ref[...].astype(jnp.float32)                   # (TM, C) f32 upcast on VPU
    targets = targets_ref[...]                                     # (TM, 1) int32
    w = w_ref[...]                                                  # (1, C)
    tm, ncls = logits.shape

    # per-row log-sum-exp (numerically stable)
    m = jnp.max(logits, axis=-1, keepdims=True)
    lse = jnp.log(jnp.sum(jnp.exp(logits - m), axis=-1, keepdims=True)) + m

    # Fused gather+loss: loss_i * w[t_i] == sum_c [t_i==c] * w_c * (lse_i - logit_ic)
    col = jax.lax.broadcasted_iota(jnp.int32, (tm, ncls), 1)
    sel = jnp.where(col == targets, w * (lse - logits), 0.0)       # (TM, C)
    contrib = jnp.sum(sel, axis=-1, keepdims=True)                 # (TM, 1)

    if needs_mask:
        # mask padded tail rows and clamped duplicate blocks (rows >= N)
        gblock = c * blocks_per_core + i
        row = gblock * tile_rows + jax.lax.broadcasted_iota(jnp.int32, (tm, 1), 0)
        contrib = jnp.where(row < n_rows, contrib, 0.0)

    acc_ref[...] = acc_ref[...] + jnp.sum(contrib)

    @pl.when(i == n_inner - 1)
    def _finalize():
        # lane-dense 128-wide partial-sum slab (unmasked vst)
        out_ref[...] = jnp.broadcast_to(acc_ref[...], out_ref.shape)


def _vmem_budget():
    """(working-set budget, declared scoped limit) adapted to the chip generation."""
    try:
        cap = int(pltpu.get_tpu_info().vmem_capacity_bytes)
    except Exception:
        cap = 64 * 1024 * 1024  # conservative fallback (v7x-sized)
    limit = min(cap // 2, 64 * 1024 * 1024)     # 64 MiB on v5e/v6e, 32 MiB on v7x
    budget = int(limit * 0.6)                   # leave headroom for compiler scratch
    return budget, limit


def _pick_tile_rows(n_rows, n_classes, itemsize, budget_bytes):
    """Rows per tile so that 2x native double-buffered tile + ~4x f32 temporaries fit."""
    bytes_per_row = n_classes * (2 * itemsize + 4 * 4) + 16
    tm = budget_bytes // bytes_per_row
    tm = int(max(8, min(tm, 32768)))
    tm -= tm % 8
    if tm >= n_rows:
        return n_rows          # single full-extent block (no (8,128) issue)
    return tm


def learnable_weighted_loss(logits, targets, class_weights, *, tile_rows=None):
    """logits: (N, C) float; targets: (N,) int; class_weights: (C,) float."""
    N, C = logits.shape
    itemsize = jnp.dtype(logits.dtype).itemsize
    targets2d = targets.astype(jnp.int32).reshape(N, 1)
    cw2d = class_weights.astype(jnp.float32).reshape(1, C)

    budget_bytes, vmem_limit = _vmem_budget()
    if tile_rows is None:
        tile_rows = _pick_tile_rows(N, C, itemsize, budget_bytes)

    num_blocks = pl.cdiv(N, tile_rows)
    blocks_per_core = pl.cdiv(num_blocks, _N_CORES)
    needs_mask = (_N_CORES * blocks_per_core * tile_rows != N)

    def logits_map(c, i):
        b = c * blocks_per_core + i
        return (jnp.minimum(b, num_blocks - 1), 0)     # clamp duplicates; rows masked

    def targets_map(c, i):
        b = c * blocks_per_core + i
        return (jnp.minimum(b, num_blocks - 1), 0)

    # Deepen the pipeline only in the tiny-tile regime (hides DMA issue latency).
    tile_bytes = tile_rows * C * itemsize
    if blocks_per_core >= 4 and tile_bytes < (512 * 1024) and hasattr(pl, "Buffered"):
        logits_spec = pl.BlockSpec((tile_rows, C), logits_map,
                                   pipeline_mode=pl.Buffered(3))
    else:
        logits_spec = pl.BlockSpec((tile_rows, C), logits_map)

    kernel = functools.partial(
        _weighted_ce_kernel, n_rows=N, tile_rows=tile_rows,
        blocks_per_core=blocks_per_core, needs_mask=needs_mask)

    out = pl.pallas_call(
        kernel,
        out_shape=jax.ShapeDtypeStruct((1, _N_CORES * 128), jnp.float32),
        grid=(_N_CORES, blocks_per_core),
        in_specs=[
            logits_spec,                                       # logits (native dtype)
            pl.BlockSpec((tile_rows, 1), targets_map),         # targets
            pl.BlockSpec((1, C), lambda c, i: (0, 0)),         # class_weights
        ],
        out_specs=pl.BlockSpec((1, 128), lambda c, i: (0, c)), # per-core partial slab
        scratch_shapes=[
            pltpu.VMEM((1, 1), jnp.float32),                   # per-core running sum
            pltpu.VMEM((1, C), jnp.float32),                   # softmaxed class weights
        ],
        compiler_params=pltpu.CompilerParams(
            dimension_semantics=("parallel", "arbitrary"),
            vmem_limit_bytes=vmem_limit,
        ),
        cost_estimate=pl.CostEstimate(
            flops=8 * N * C,
            transcendentals=N * C + C,
            bytes_accessed=int(N * C * itemsize + N * 4 + C * 4 + _N_CORES * 128 * 4),
        ),
    )(logits, targets2d, cw2d)

    partials = out.reshape(_N_CORES, 128)[:, 0]                # one scalar per core
    return jnp.sum(partials) / N


def _reference(logits, targets, class_weights):
    w = jax.nn.softmax(class_weights)
    ce = -jax.nn.log_softmax(logits, axis=-1)[jnp.arange(logits.shape[0]), targets]
    return jnp.mean(ce * w[targets])


if __name__ == "__main__":
    key = jax.random.PRNGKey(0)

    # --- case 1: tiny batch, single block per core (block == full array) ---
    N, C = 8, 16
    k1, k2, key = jax.random.split(key, 3)
    logits = jax.random.normal(k1, (N, C), dtype=jnp.float32)
    targets = jax.random.randint(k2, (N,), 0, C, dtype=jnp.int32)
    weight_init = jnp.linspace(0.5, 1.5, C).astype(jnp.float32)

    loss = jax.block_until_ready(learnable_weighted_loss(logits, targets, weight_init))
    ref = _reference(logits, targets, weight_init)
    assert jnp.allclose(loss, ref, atol=1e-5, rtol=1e-5), (loss, ref)

    # --- case 2: multi-block grid, odd block count split across the 2 partials,
    #             masked partial tail (N not a multiple of TM) ---
    N2, C2, TM2 = 37, 24, 8
    k3, k4, _ = jax.random.split(key, 3)
    logits2 = jax.random.normal(k3, (N2, C2), dtype=jnp.float32)
    targets2 = jax.random.randint(k4, (N2,), 0, C2, dtype=jnp.int32)
    weight_init2 = jnp.linspace(-1.0, 1.0, C2).astype(jnp.float32)

    loss2 = jax.block_until_ready(
        learnable_weighted_loss(logits2, targets2, weight_init2, tile_rows=TM2))
    ref2 = _reference(logits2, targets2, weight_init2)
    assert jnp.allclose(loss2, ref2, atol=1e-5, rtol=1e-5), (loss2, ref2)

    print("KERNEL_OK")
</pallas_src>

<mosaic_0001>
module attributes {stable_mosaic.version = 11 : i64} {
  func.func @_weighted_ce_kernel(%arg0: i32, %arg1: i32, %arg2: memref<8x16xf32, #tpu.memory_space<vmem>>, %arg3: memref<8x1xi32, #tpu.memory_space<vmem>>, %arg4: memref<1x16xf32, #tpu.memory_space<vmem>>, %arg5: memref<1x128xf32, #tpu.memory_space<vmem>>, %arg6: memref<1x1xf32, #tpu.memory_space<vmem>>, %arg7: memref<1x16xf32, #tpu.memory_space<vmem>>) attributes {dimension_semantics = [#tpu.dimension_semantics<parallel>, #tpu.dimension_semantics<arbitrary>], iteration_bounds = array<i64: 2, 1>, scalar_prefetch = 0 : i64, scratch_operands = 2 : i64, tpu.core_type = #tpu.core_type<tc>, window_params = [{transform_indices = @transform_0, window_bounds = array<i64: 8, 16>}, {transform_indices = @transform_1, window_bounds = array<i64: 8, 1>}, {pipeline_mode = #tpu.pipeline_mode<synchronous>, transform_indices = @transform_2, window_bounds = array<i64: 1, 16>}, {transform_indices = @transform_3, window_bounds = array<i64: 1, 128>}]} {
    %c0_i32 = arith.constant 0 : i32
    %0 = arith.cmpi eq, %arg1, %c0_i32 : i32
    %1 = arith.extui %0 : i1 to i32
    %c0_i32_0 = arith.constant 0 : i32
    %2 = arith.cmpi ne, %1, %c0_i32_0 : i32
    scf.if %2 {
      %cst_18 = arith.constant 0.000000e+00 : f32
      %47 = vector.broadcast %cst_18 : f32 to vector<1x1xf32>
      %c0_19 = arith.constant 0 : index
      %c0_20 = arith.constant 0 : index
      %48 = vector.load %arg6[%c0_19, %c0_20] : memref<1x1xf32, #tpu.memory_space<vmem>>, vector<1x1xf32>
      tpu.vector_store %arg6[%c0_19, %c0_20], %47 {strides = array<i32>} : memref<1x1xf32, #tpu.memory_space<vmem>>, vector<1x1xf32>,
      %c0_21 = arith.constant 0 : index
      %c0_22 = arith.constant 0 : index
      %49 = vector.load %arg4[%c0_21, %c0_22] : memref<1x16xf32, #tpu.memory_space<vmem>>, vector<1x16xf32>
      %cst_23 = arith.constant dense<0xFF800000> : vector<1xf32>
      %50 = vector.multi_reduction <maximumf>, %49, %cst_23 [1] : vector<1x16xf32> to vector<1xf32>
      %51 = vector.shape_cast %50 : vector<1xf32> to vector<1x1xf32>
      %52 = vector.broadcast %51 : vector<1x1xf32> to vector<1x16xf32>
      %53 = arith.subf %49, %52 : vector<1x16xf32>
      %54 = math.exp %53 : vector<1x16xf32>
      %cst_24 = arith.constant dense<0.000000e+00> : vector<1xf32>
      %55 = vector.multi_reduction <add>, %54, %cst_24 [1] : vector<1x16xf32> to vector<1xf32>
      %56 = vector.shape_cast %55 : vector<1xf32> to vector<1x1xf32>
      %57 = vector.broadcast %56 : vector<1x1xf32> to vector<1x16xf32>
      %58 = arith.divf %54, %57 : vector<1x16xf32>
      %c0_25 = arith.constant 0 : index
      %c0_26 = arith.constant 0 : index
      %59 = vector.load %arg7[%c0_25, %c0_26] : memref<1x16xf32, #tpu.memory_space<vmem>>, vector<1x16xf32>
      tpu.vector_store %arg7[%c0_25, %c0_26], %58 {strides = array<i32>} : memref<1x16xf32, #tpu.memory_space<vmem>>, vector<1x16xf32>,
    } else {
    }
    %c0 = arith.constant 0 : index
    %c0_1 = arith.constant 0 : index
    %3 = vector.load %arg2[%c0, %c0_1] : memref<8x16xf32, #tpu.memory_space<vmem>>, vector<8x16xf32>
    %c0_2 = arith.constant 0 : index
    %c0_3 = arith.constant 0 : index
    %4 = vector.load %arg3[%c0_2, %c0_3] : memref<8x1xi32, #tpu.memory_space<vmem>>, vector<8x1xi32>
    %c0_4 = arith.constant 0 : index
    %c0_5 = arith.constant 0 : index
    %5 = vector.load %arg7[%c0_4, %c0_5] : memref<1x16xf32, #tpu.memory_space<vmem>>, vector<1x16xf32>
    %cst = arith.constant dense<0xFF800000> : vector<8xf32>
    %6 = vector.multi_reduction <maximumf>, %3, %cst [1] : vector<8x16xf32> to vector<8xf32>
    %7 = vector.shape_cast %6 : vector<8xf32> to vector<8x1xf32>
    %8 = vector.broadcast %7 : vector<8x1xf32> to vector<8x16xf32>
    %9 = arith.subf %3, %8 : vector<8x16xf32>
    %10 = math.exp %9 : vector<8x16xf32>
    %cst_6 = arith.constant dense<0.000000e+00> : vector<8xf32>
    %11 = vector.multi_reduction <add>, %10, %cst_6 [1] : vector<8x16xf32> to vector<8xf32>
    %12 = vector.shape_cast %11 : vector<8xf32> to vector<8x1xf32>
    %13 = math.log %12 : vector<8x1xf32>
    %14 = arith.addf %13, %7 : vector<8x1xf32>
    %15 = tpu.iota {dimensions = array<i32: 1>} : vector<8x16xi32>
    %16 = vector.broadcast %4 : vector<8x1xi32> to vector<8x16xi32>
    %17 = arith.cmpi eq, %15, %16 : vector<8x16xi32>
    %18 = vector.broadcast %14 : vector<8x1xf32> to vector<8x16xf32>
    %19 = arith.subf %18, %3 : vector<8x16xf32>
    %20 = vector.broadcast %5 : vector<1x16xf32> to vector<8x16xf32>
    %21 = arith.mulf %20, %19 : vector<8x16xf32>
    %cst_7 = arith.constant 0.000000e+00 : f32
    %22 = vector.broadcast %cst_7 : f32 to vector<8x16xf32>
    %23 = arith.select %17, %21, %22 : vector<8x16xi1>, vector<8x16xf32>
    %cst_8 = arith.constant dense<0.000000e+00> : vector<8xf32>
    %24 = vector.multi_reduction <add>, %23, %cst_8 [1] : vector<8x16xf32> to vector<8xf32>
    %25 = vector.shape_cast %24 : vector<8xf32> to vector<8x1xf32>
    %c1_i32 = arith.constant 1 : i32
    %26 = arith.muli %arg0, %c1_i32 : i32
    %27 = arith.addi %26, %arg1 : i32
    %c8_i32 = arith.constant 8 : i32
    %28 = arith.muli %27, %c8_i32 : i32
    %29 = tpu.iota {dimensions = array<i32: 0>} : vector<8x1xi32>
    %30 = vector.broadcast %28 : i32 to vector<8x1xi32>
    %31 = arith.addi %30, %29 : vector<8x1xi32>
    %c8_i32_9 = arith.constant 8 : i32
    %32 = vector.broadcast %c8_i32_9 : i32 to vector<8x1xi32>
    %33 = arith.cmpi slt, %31, %32 : vector<8x1xi32>
    %cst_10 = arith.constant 0.000000e+00 : f32
    %34 = vector.broadcast %cst_10 : f32 to vector<8x1xf32>
    %35 = arith.select %33, %25, %34 : vector<8x1xi1>, vector<8x1xf32>
    %c0_11 = arith.constant 0 : index
    %c0_12 = arith.constant 0 : index
    %36 = vector.load %arg6[%c0_11, %c0_12] : memref<1x1xf32, #tpu.memory_space<vmem>>, vector<1x1xf32>
    %37 = vector.shape_cast %35 : vector<8x1xf32> to vector<1x8x1xf32>
    %cst_13 = arith.constant dense<0.000000e+00> : vector<1xf32>
    %38 = vector.multi_reduction <add>, %37, %cst_13 [1, 2] : vector<1x8x1xf32> to vector<1xf32>
    %39 = vector.shape_cast %38 : vector<1xf32> to vector<1x1x1xf32>
    %40 = vector.extract %39[0, 0, 0] : f32 from vector<1x1x1xf32>
    %41 = vector.broadcast %40 : f32 to vector<1x1xf32>
    %42 = arith.addf %36, %41 : vector<1x1xf32>
    %c0_14 = arith.constant 0 : index
    %c0_15 = arith.constant 0 : index
    %43 = vector.load %arg6[%c0_14, %c0_15] : memref<1x1xf32, #tpu.memory_space<vmem>>, vector<1x1xf32>
    tpu.vector_store %arg6[%c0_14, %c0_15], %42 {strides = array<i32>} : memref<1x1xf32, #tpu.memory_space<vmem>>, vector<1x1xf32>,
    %c0_i32_16 = arith.constant 0 : i32
    %44 = arith.cmpi eq, %arg1, %c0_i32_16 : i32
    %45 = arith.extui %44 : i1 to i32
    %c0_i32_17 = arith.constant 0 : i32
    %46 = arith.cmpi ne, %45, %c0_i32_17 : i32
    scf.if %46 {
      %c0_18 = arith.constant 0 : index
      %c0_19 = arith.constant 0 : index
      %47 = vector.load %arg6[%c0_18, %c0_19] : memref<1x1xf32, #tpu.memory_space<vmem>>, vector<1x1xf32>
      %48 = vector.shape_cast %47 : vector<1x1xf32> to vector<1x1xf32>
      %49 = vector.broadcast %48 : vector<1x1xf32> to vector<1x128xf32>
      %c0_20 = arith.constant 0 : index
      %c0_21 = arith.constant 0 : index
      %50 = vector.load %arg5[%c0_20, %c0_21] : memref<1x128xf32, #tpu.memory_space<vmem>>, vector<1x128xf32>
      tpu.vector_store %arg5[%c0_20, %c0_21], %49 {strides = array<i32>} : memref<1x128xf32, #tpu.memory_space<vmem>>, vector<1x128xf32>,
    } else {
    }
    return
  }
  func.func @transform_0(%arg0: i32, %arg1: i32) -> (i32, i32) {
    %c1_i32 = arith.constant 1 : i32
    %0 = arith.muli %arg0, %c1_i32 : i32
    %1 = arith.addi %0, %arg1 : i32
    %c0_i32 = arith.constant 0 : i32
    %2 = arith.minsi %1, %c0_i32 : i32
    %c0_i32_0 = arith.constant 0 : i32
    %c0_i32_1 = arith.constant 0 : i32
    return %2, %c0_i32_0 : i32, i32
  }
  func.func @transform_1(%arg0: i32, %arg1: i32) -> (i32, i32) {
    %c1_i32 = arith.constant 1 : i32
    %0 = arith.muli %arg0, %c1_i32 : i32
    %1 = arith.addi %0, %arg1 : i32
    %c0_i32 = arith.constant 0 : i32
    %2 = arith.minsi %1, %c0_i32 : i32
    %c0_i32_0 = arith.constant 0 : i32
    %c0_i32_1 = arith.constant 0 : i32
    return %2, %c0_i32_0 : i32, i32
  }
  func.func @transform_2(%arg0: i32, %arg1: i32) -> (i32, i32) {
    %c0_i32 = arith.constant 0 : i32
    %c0_i32_0 = arith.constant 0 : i32
    %c0_i32_1 = arith.constant 0 : i32
    return %c0_i32, %c0_i32_0 : i32, i32
  }
  func.func @transform_3(%arg0: i32, %arg1: i32) -> (i32, i32) {
    %c0_i32 = arith.constant 0 : i32
    %c0_i32_0 = arith.constant 0 : i32
    return %c0_i32, %arg0 : i32, i32
  }
}

</mosaic_0001>

<bundles_post_ra>
// kernel: tpu_custom_call.1
= control target key start
LH: loop header
LB: loop body
LE: loop exit
PB: predicated region body
PF: predicated region fallthrough
CT: control target
= control target key end

     0   :  { %8 = vsyncpa [#allocation5], 0  ;;  %s722_s0 = inlined_call_operand.vmem [shape: f32[8,16], index: 0, kind: input, shape index: {}]   ;;  %s723_s1 = inlined_call_operand.vmem [shape: s32[8,1], index: 1, kind: input, shape index: {}]   ;;  %s724_s2 = inlined_call_operand.vmem [shape: f32[1,16], index: 2, kind: input, shape index: {}]   ;;  %s725_s3 = inlined_call_operand.hbm [shape: f32[1,256], index: 3, kind: output, shape index: {}]  }
   0x1   :  { %10 = vsyncpa [#allocation5 + $0x1], 0  ;;  %s612_s12 = smov 0   ;;  %s614_s13 = smov 0  }
   0x2   :  { %s616_s14 = smov 0   ;;  %s618_s15 = smov 0  }
   0x3   :  { %s620_s16 = smov 0   ;;  %s622_s17 = smov 0  }
   0x4 LB: > { %s423_s18 = sadd.s32 4294967295, %s588_s17   ;;  %s424_s19 = sadd.s32 4294967294, %s588_s17   ;;  %s588_s17 = sphi %s622_s17, %s16_s17   ;;  %s584_s16 = sphi %s620_s16, %s732_s16   ;;  %s580_s15 = sphi %s618_s15, %s731_s15   ;;  %s576_s14 = sphi %s616_s14, %s730_s14   ;;  %s572_s13 = sphi %s614_s13, %s729_s13   ;;  %s568_s12 = sphi %s612_s12, %s728_s12  }
   0x5   : > { %s28_s20 = sadd.s32 1, %s584_s16  ;;  %s120_s21 = sadd.s32 1, %s576_s14 }
   0x6   : > { %p30_p0 = scmp.ge.s32.totalorder %s28_s20, 2  ;;  %p130_p1 = scmp.ne.s32.totalorder %s576_s14, %s572_s13 }
   0x7   : > { %p131_p2 = scmp.eq.s32.totalorder %s423_s18, 1  ;;  %p136_p3 = scmp.ne.s32.totalorder %s572_s13, %s568_s12 }
   0x8   : > { %s734_s20 = smov (%p30_p0, %s28_s20), 0  ;;  %p137_p5 = scmp.eq.s32.totalorder %s424_s19, 1 }
   0x9   : > { %p652_p4 = por %p131_p2, %p130_p1  ;;  %s117_s23 = ssub.s32 %s584_s16, %s734_s20 }
   0xa   : > { %p427_p6 = scmp.ge.s32.totalorder %s588_s17, 1  ;;  %p118_p7 = scmp.eq.s32.totalorder %s117_s23, 0 }
   0xb   : > { %p659_p8 = por %p137_p5, %p136_p3  ;;  %p184_p9 = scmp.lt.s32.totalorder %s588_s17, 3 }
   0xc   : > { %s665_s25 = scalar_select %p118_p7, %s576_s14, %s120_s21  }
   0xd   : > { %p185_p10 = pnand %p427_p6, %p184_p9 }
   0xe   : > { %p217_p11 = scmp.lt.s32.totalorder (!%p185_p10), %s580_s15, 0  ;;  %s436_s9 = sshll.u32 (!%p185_p10), %s580_s15, 3 }
   0xf   : > { %188 = sbr.rel (%p185_p10) target bundleno = 724 (0x2d4), region = 32  ;;  %s214_s11 = sand.u32 (!%p185_p10), 1, %s572_s13  }
  0x10   : > { %s344_s21 = scalar_lea.hbm (!%p185_p10), %s725_s3, %s580_s15  ;;  %s215_s23 = scalar_lea.vmem (!%p185_p10), [#allocation4], %s214_s11 }
  0x11   : > { %s346_s26 = sshll.u32 (!%p185_p10), %s215_s23, 4  ;;  %s348_s27 = sshll.u32 (!%p185_p10), %s344_s21, 4  ;;  %s347_s26 = int_to_ptr.vmem [resolvable:$true] %s346_s26  ;;  %s349_s27 = int_to_ptr.hbm [resolvable:$true] %s348_s27 }
  0x14   : > { %v242_v0 = vld [vmem:[%s724_s2] sm:$0x1]  ;;  %vm243_vm0 = vcmask 122880   ;;  %s218_s28 = scalar_select %p217_p11, %s580_s15, 0  ;;  %vm272_vm1 = vcmask 130048   ;;  %v590_v5 = vmov 0   ;;  %v285_v31 = vlaneseq }
  0x15   : > { %v244_v1 = vsel %vm243_vm0, %v242_v0, -inf  ;;  %498 = vset.pattern.permute.xlu2 %v590_v5  ;;  %499 = vset.pattern.permute.xlu1 %v590_v5  ;;  %v304_v41 = vstv %s436_s9  ;;  %vm309_vm8 = vcmask 7168   ;;  %vm240_vm9 = vcmask 0   ;;  %s530_s15 = scalar_lea.hbm %s725_s3, 2 }
  0x16   : > { %245 = vmax.xlane.f32.xlu0 %v244_v1  ;;  %s736_s28 = smov (!%p217_p11, %s218_s28), 0  ;;  %v286_v33 = vand.u32 127, %v285_v31  ;;  %v303_v40 = vshrl.u32 %v285_v31, 7  ;;  %v591_v46 = vmov 0.0  }
  0x17   : > { %s431_s29 = sshll.u32 %s736_s28, 3  ;;  %500 = vset.pattern.permute.xlu0 %v590_v5  ;;  %241 = vst.msk [vmem:[#allocation2] sm:$0x1] %vm240_vm9, %v591_v46  ;;  %s336_s28 = scalar_lea.sflag [#allocation5], %s214_s11 }
  0x18   : > { %s222_s5 = scalar_lea.vmem %s722_s0, %s431_s29  ;;  %s232_s8 = scalar_lea.vmem %s723_s1, %s431_s29  ;;  %v305_v42 = vadd.s32 %v304_v41, %v303_v40 }
  0x19   : > { %v269_v2 = vld [vmem:[%s222_s5] sm:$0xff]  ;;  %s524_s29 = sshra.s32 %s349_s27, 4  ;;  %s525_s29 = int_to_ptr.hbm [resolvable:$true] %s524_s29 }
  0x1a   : > { %v273_v3 = vsel %vm272_vm1, %v269_v2, -inf  ;;  %v270_v4 = vld [vmem:[%s232_s8] sm:$0xff]  ;;  %vm306_vm7 = vcmp.lt.s32.totalorder %v305_v42, 8  ;;  %s526_s30 = scalar_lea.hbm %s525_s29, 1  ;;  %p531_p1 = scmp.lt.s32.totalorder %s525_s29, %s725_s3 }
  0x1b   : > { %288 = vperm.xlu2 %498, %v270_v4   ;;  %p527_p12 = scmp.ne.s32.totalorder %s525_s29, %s526_s30  ;;  %p532_p2 = scmp.lt.s32.totalorder %s530_s15, %s526_s30 }
  0x1d   : > { %p528_p13 = pnand %p527_p12, %p652_p4  ;;  %p533_p3 = por %p532_p2, %p531_p1 }
  0x1e   : > { %274 = vmax.xlane.f32.xlu0 %v273_v3  ;;  %v308_v54 = vld [vmem:[#allocation2] sm:$0x1] }
  0x1f   : > { %p529_p0 = pneg %p528_p13 }
  0x21   : > { %p534_p5 = pnand %p533_p3, %p529_p0 }
  0x75   : > { %v289_v34 = vpop.permute.xlu2 %288 }
  0x76   : > { %vm290_vm6 = vcmp.eq.s32.totalorder %v286_v33, %v289_v34 }
  0x89   : > { %v246_v6 = vpop.xlane.xlu0 %245 }
  0x8a   : > { %v247_v7 = vsub.f32 %v242_v0, %v246_v6 }
  0x8c   : > { %v248_v8 = vmul.f32 1.442695, %v247_v7 }
  0x8e   : > { %502 = vpow2.f32 %v248_v8 }
  0x91   : > { %v275_v9 = vpop.xlane.xlu0 %274 }
  0x92   : > { %v276_v10 = vsub.f32 %v269_v2, %v275_v9 }
  0x94   : > { %v503_v11 = vpop.eup %502  ;;  %v277_v12 = vmul.f32 1.442695, %v276_v10 }
  0x95   : > { %v250_v13 = vsel %vm243_vm0, %v503_v11, 0.0 }
  0x96   : > { %504 = vpow2.f32 %v277_v12  ;;  %251 = vadd.xlane.f32.xlu1 %v250_v13 }
  0x9c   : > { %v505_v14 = vpop.eup %504 }
  0x9d   : > { %v279_v15 = vsel %vm272_vm1, %v505_v14, 0.0 }
  0x9e   : > { %280 = vadd.xlane.f32.xlu1 %v279_v15 }
 0x109   : > { %v252_v16 = vpop.xlane.xlu1 %251 }
 0x10a   : > { %506 = vrcp.f32 %v252_v16  ;;  %v264_v21 = vand.u32 2147483648, %v252_v16  ;;  %v262_v23 = vand.u32 2147483647, %v252_v16  ;;  %vm258_vm3 = vweird.f32 %v252_v16 }
 0x10c   : > { %v265_v25 = vor.u32 1.1754944e-38, %v264_v21  ;;  %vm263_vm5 = vcmp.eq.f32.partialorder %v262_v23, 8.507059e+37 }
 0x110   : > { %v507_v17 = vpop.eup %506 }
 0x111   : > { %v254_v18 = vmul.f32 %v507_v17, %v252_v16  ;;  %v281_v19 = vpop.xlane.xlu1 %280  ;;  %vm259_vm2 = vweird.f32 %v507_v17 }
 0x112   : > { %508 = vlog2.f32 %v281_v19  ;;  %vm260_vm4 = vmor %vm258_vm3, %vm259_vm2 }
 0x113   : > { %v255_v20 = vsub.f32 1.0, %v254_v18 }
 0x115   : > { %v256_v22 = vmul.f32 %v507_v17, %v255_v20 }
 0x117   : > { %v257_v24 = vadd.f32 %v507_v17, %v256_v22 }
 0x118   : > { %v509_v26 = vpop.eup %508 }
 0x119   : > { %v261_v27 = vsel %vm260_vm4, %v507_v17, %v257_v24  ;;  %v283_v30 = vmul.f32 0.6931472, %v509_v26 }
 0x11a   : > { %v266_v28 = vsel %vm263_vm5, %v265_v25, %v261_v27 }
 0x11b   : > { %v267_v29 = vmul.f32 %v503_v11, %v266_v28  ;;  %v284_v32 = vadd.f32 %v283_v30, %v275_v9 }
 0x11d   : > { %268 = vst.msk [vmem:[#allocation3] sm:$0x1] %vm243_vm0, %v267_v29  ;;  %v291_v35 = vsub.f32 %v284_v32, %v269_v2 }
 0x124   : > { %v501_v36 = vld [vmem:[#allocation3] ss:$0 sm:$0xff] }
 0x125   : > { %v295_v37 = vmul.f32 %v501_v36, %v291_v35 }
 0x127   : > { %v296_v38 = vsel %vm290_vm6, %v295_v37, 0.0 }
 0x128   : > { %v297_v39 = vsel %vm272_vm1, %v296_v38, 0.0 }
 0x129   : > { %298 = vadd.xlane.f32.xlu2 %v297_v39 }
 0x19c   : > { %v299_v43 = vpop.xlane.xlu2 %298 }
 0x19d   : > { %v307_v44 = vsel %vm306_vm7, %v299_v43, 0.0 }
 0x19e   : > { %v310_v45 = vsel %vm309_vm8, %v307_v44, 0.0 }
 0x19f   : > { %311 = vadd.xlane.f32.xlu0 %v310_v45 }
 0x212   : > { %v312_v47 = vpop.xlane.xlu0 %311 }
 0x213   : > { %v313_v48 = vrot.slane %v312_v47, 4 }
 0x215   : > { %v314_v49 = vadd.f32 %v313_v48, %v312_v47 }
 0x217   : > { %v315_v50 = vrot.slane %v314_v49, 2 }
 0x219   : > { %v316_v51 = vadd.f32 %v315_v50, %v314_v49 }
 0x21b   : > { %v317_v52 = vrot.slane %v316_v51, 1 }
 0x21d   : > { %v318_v53 = vadd.f32 %v317_v52, %v316_v51 }
 0x21f   : > { %439 = vpush %v318_v53 }
 0x250   : > { %s440_s10 = spop %439 }
 0x251   : > { %v320_v55 = vstv %s440_s10 }
 0x252   : > { %v321_v56 = vadd.f32 %v320_v55, %v308_v54 }
 0x254   : > { %323 = vst.msk [vmem:[#allocation2] sm:$0x1] %vm240_vm9, %v321_v56 }
 0x25b   : > { %v327_v57 = vld [vmem:[#allocation2] sm:$0x1] }
 0x25c   : > { %330 = vperm.xlu1 %499, %v327_v57  }
 0x2ce   : > { %v331_v58 = vpop.permute.xlu1 %330 }
 0x2cf   : > { %v333_v59 = vperm.slane %v331_v58, 0 }
 0x2d1   : > { %334 = vst [vmem:[%s215_s23] sm:$0x1] %v333_v59 }
 0x2d2   : > { %537 = shalt.err (!%p534_p5)
}
 0x2d3   : > { %441 = dma.vmem_to_hbm [thread:$0]  (%p652_p4), %s347_s26, 16, %s349_s27, %s336_s28  }
 0x2d4 PF: > { %p447_p6 = scmp.ge.s32.totalorder %s588_s17, 2  ;;  %s360_s8 = sand.u32 1, %s568_s12  }
 0x2d5   : > { %s361_s9 = scalar_lea.sflag [#allocation5], %s360_s8 }
 0x2d6   : > { %p444_p7 = pnand %p447_p6, %p659_p8 }
 0x2d8   : > { %p445_p9 = pneg %p444_p7 }
 0x2da   : > { %563 = dma.done.wait (%p445_p9), %s361_s9, 16  }
 0x2db   : > { %565 = vsyncadd (%p445_p9), %s361_s9, 4294967280  ;;  %s16_s17 = sadd.s32 1, %s588_s17   ;;  %s728_s12 = smov %s572_s13 }
 0x2dc   : > { %p13_p10 = scmp.ge.s32.totalorder %s16_s17, 4   ;;  %s729_s13 = smov %s576_s14 }
 0x2dd   : > { %s730_s14 = smov %s665_s25  ;;  %s731_s15 = smov %s584_s16 }
 0x2de   : > { %s732_s16 = smov %s734_s20  ;;  %15 = sbr.rel (!%p13_p10) target bundleno = 4 (0x4), region = 78 }
 0x2e3   :  { %366 = vsyncpa [#allocation5], 1 }
 0x2e4   :  { %368 = vsyncpa [#allocation5 + $0x1], 1 }

</bundles_post_ra>
